<compile_context>
chip_gen: v7x
topology: tpu7x:2x2x1
jax: 0.10.0
libtpu: 0.0.40
codegen_flags: <defaults>
</compile_context>

<pallas_src>
import math

import jax
import jax.numpy as jnp
from jax.experimental import pallas as pl
from jax.experimental.pallas import tpu as pltpu


_LANE = 128
_SUB = 8
_TILE_BYTES = 4 << 20      # ~4 MiB prediction tile per pipeline buffer


def _num_parallel_splits():
    """2 on dual-TensorCore chips (v7x, v4/v5p megacore), else 1."""
    try:
        kind = jax.devices()[0].device_kind.lower()
    except Exception:
        return 1
    if "7x" in kind or "v7" in kind or "v4" in kind or "v5p" in kind:
        return 2
    return 1


def mse_loss_wrapper(predictions, targets):
    """mean((argmax(predictions, -1).float() - targets.float())**2) as f32 scalar."""
    k = predictions.shape[-1]
    n = math.prod(predictions.shape[:-1])
    itemsize = predictions.dtype.itemsize

    pred2d = predictions.reshape(n, k)
    tgt1d = targets.reshape(n)

    n8 = (n // _SUB) * _SUB            # rows handled by the kernel
    m = n8 // _SUB                     # columns per sublane row

    # ---------------- bulk: Pallas kernel over the (k, 8, m) view ----------------
    if m > 0:
        # one copy pass total (prefix-slice + reshape fuse into the transpose)
        pred_kd = pred2d[:n8].reshape(_SUB, m, k).transpose(2, 0, 1)   # (k, 8, m)
        tgt_kd = tgt1d[:n8].astype(jnp.float32).reshape(_SUB, m)       # (8, m)

        tile_c = max(_LANE, (_TILE_BYTES // (k * _SUB * itemsize)) // _LANE * _LANE)
        if m <= tile_c:
            tile_c = m                 # single full-extent column block
        nb = -(-m // tile_c)           # number of real column blocks

        splits = max(1, min(_num_parallel_splits(), nb))
        tps = -(-nb // splits)         # column blocks per split
        ragged = (m % tile_c != 0) or (tps * splits != nb)

        def col_block(c, i):
            b = c * tps + i
            return jnp.minimum(b, nb - 1) if ragged else b

        def kernel(pred_ref, tgt_ref, out_ref, acc_ref):
            c = pl.program_id(0)
            i = pl.program_id(1)

            @pl.when(i == 0)
            def _init():
                acc_ref[...] = jnp.zeros_like(acc_ref)

            t = tgt_ref[...]                                   # (8, T) f32

            # first-index argmax over the k category planes: purely elementwise
            # (VPU), dense (8, T) operands, no iota, no cross-lane reductions.
            best_v = pred_ref[0]                               # (8, T) native dtype
            best_i = jnp.zeros(best_v.shape, jnp.float32)
            for cat in range(1, k):
                cand = pred_ref[cat]
                take = cand > best_v                           # strict -> first index wins
                best_v = jnp.where(take, cand, best_v)
                best_i = jnp.where(take, jnp.float32(cat), best_i)

            diff = best_i - t
            sq = diff * diff

            if ragged:
                blk = c * tps + i                              # un-clamped global block idx

                @pl.when(blk < nb - 1)
                def _bulk():
                    acc_ref[...] += sq

                @pl.when(blk >= nb - 1)
                def _tail():                                   # masked: tail / overflow block
                    col = blk * tile_c + jax.lax.broadcasted_iota(
                        jnp.int32, sq.shape, 1)
                    acc_ref[...] += jnp.where(col < m, sq, 0.0)
            else:
                acc_ref[...] += sq

            @pl.when(i == pl.num_programs(1) - 1)
            def _fin():
                out_ref[0, 0] = jnp.sum(acc_ref[...])          # raw partial sum -> SMEM

        partials = pl.pallas_call(
            kernel,
            out_shape=jax.ShapeDtypeStruct((splits, 1), jnp.float32),
            grid_spec=pltpu.PrefetchScalarGridSpec(
                num_scalar_prefetch=0,
                grid=(splits, tps),
                in_specs=[
                    pl.BlockSpec((k, _SUB, tile_c),
                                 lambda c, i: (0, 0, col_block(c, i))),
                    pl.BlockSpec((_SUB, tile_c),
                                 lambda c, i: (0, col_block(c, i))),
                ],
                out_specs=pl.BlockSpec(
                    (1, 1), lambda c, i: (c, 0),
                    memory_space=pltpu.MemorySpace.SMEM),
                scratch_shapes=[pltpu.VMEM((_SUB, tile_c), jnp.float32)],
            ),
            compiler_params=pltpu.CompilerParams(
                dimension_semantics=("parallel", "arbitrary"),
                vmem_limit_bytes=32 * 1024 * 1024,
            ),
            cost_estimate=pl.CostEstimate(
                flops=4 * n8 * k,
                transcendentals=0,
                bytes_accessed=n8 * k * itemsize + n8 * 4 + splits * 4,
            ),
        )(pred_kd, tgt_kd)
        main_sum = jnp.sum(partials)
    else:
        main_sum = jnp.float32(0.0)

    # ---------------- tail: < 8 leftover rows in plain jnp (tiny) ----------------
    if n8 < n:
        t_pred = pred2d[n8:]
        t_tgt = tgt1d[n8:].astype(jnp.float32)
        t_idx = jnp.argmax(t_pred, axis=-1).astype(jnp.float32)
        tail_sum = jnp.sum((t_idx - t_tgt) ** 2)
    else:
        tail_sum = jnp.float32(0.0)

    return (main_sum + tail_sum) / jnp.float32(n)


if __name__ == "__main__":
    key = jax.random.PRNGKey(0)
    kp, kt = jax.random.split(key)

    B, S, K = 2, 8, 4  # batch, sequence, ordinal categories
    predictions = jax.random.normal(kp, (B, S, K), dtype=jnp.float32)
    targets = jax.random.randint(kt, (B, S), 0, K, dtype=jnp.int32)

    loss = mse_loss_wrapper(predictions, targets)
    jax.block_until_ready(loss)

    # reference check (pure JAX)
    ref = jnp.mean(
        (jnp.argmax(predictions, axis=-1).astype(jnp.float32)
         - targets.astype(jnp.float32)) ** 2
    )
    assert jnp.allclose(loss, ref, atol=1e-5, rtol=1e-5), (loss, ref)

    print("KERNEL_OK")
</pallas_src>

<mosaic_0001>
module attributes {stable_mosaic.version = 11 : i64} {
  func.func @kernel(%arg0: i32, %arg1: i32, %arg2: memref<4x8x2xf32, #tpu.memory_space<vmem>>, %arg3: memref<8x2xf32, #tpu.memory_space<vmem>>, %arg4: memref<1x1xf32, #tpu.memory_space<smem>>, %arg5: memref<8x2xf32, #tpu.memory_space<vmem>>) attributes {dimension_semantics = [#tpu.dimension_semantics<parallel>, #tpu.dimension_semantics<arbitrary>], iteration_bounds = array<i64: 1, 1>, scalar_prefetch = 0 : i64, scratch_operands = 1 : i64, tpu.core_type = #tpu.core_type<tc>, window_params = [{transform_indices = @transform_0, window_bounds = array<i64: 4, 8, 2>}, {transform_indices = @transform_1, window_bounds = array<i64: 8, 2>}, {transform_indices = @transform_2, window_bounds = array<i64: 1, 1>}]} {
    %c0_i32 = arith.constant 0 : i32
    %0 = arith.cmpi eq, %arg1, %c0_i32 : i32
    %1 = arith.extui %0 : i1 to i32
    %c0_i32_0 = arith.constant 0 : i32
    %2 = arith.cmpi ne, %1, %c0_i32_0 : i32
    scf.if %2 {
      %cst_20 = arith.constant 0.000000e+00 : f32
      %32 = vector.broadcast %cst_20 : f32 to vector<8x2xf32>
      %c0_21 = arith.constant 0 : index
      %c0_22 = arith.constant 0 : index
      %33 = vector.load %arg5[%c0_21, %c0_22] : memref<8x2xf32, #tpu.memory_space<vmem>>, vector<8x2xf32>
      tpu.vector_store %arg5[%c0_21, %c0_22], %32 {strides = array<i32>} : memref<8x2xf32, #tpu.memory_space<vmem>>, vector<8x2xf32>,
    } else {
    }
    %c0 = arith.constant 0 : index
    %c0_1 = arith.constant 0 : index
    %3 = vector.load %arg3[%c0, %c0_1] : memref<8x2xf32, #tpu.memory_space<vmem>>, vector<8x2xf32>
    %c0_2 = arith.constant 0 : index
    %c0_3 = arith.constant 0 : index
    %c0_4 = arith.constant 0 : index
    %4 = vector.load %arg2[%c0_2, %c0_3, %c0_4] : memref<4x8x2xf32, #tpu.memory_space<vmem>>, vector<1x8x2xf32>
    %5 = vector.shape_cast %4 : vector<1x8x2xf32> to vector<8x2xf32>
    %cst = arith.constant 0.000000e+00 : f32
    %6 = vector.broadcast %cst : f32 to vector<8x2xf32>
    %c1 = arith.constant 1 : index
    %c0_5 = arith.constant 0 : index
    %c0_6 = arith.constant 0 : index
    %7 = vector.load %arg2[%c1, %c0_5, %c0_6] : memref<4x8x2xf32, #tpu.memory_space<vmem>>, vector<1x8x2xf32>
    %8 = vector.shape_cast %7 : vector<1x8x2xf32> to vector<8x2xf32>
    %9 = arith.cmpf ogt, %8, %5 : vector<8x2xf32>
    %10 = arith.select %9, %8, %5 : vector<8x2xi1>, vector<8x2xf32>
    %cst_7 = arith.constant 1.000000e+00 : f32
    %11 = vector.broadcast %cst_7 : f32 to vector<8x2xf32>
    %12 = arith.select %9, %11, %6 : vector<8x2xi1>, vector<8x2xf32>
    %c2 = arith.constant 2 : index
    %c0_8 = arith.constant 0 : index
    %c0_9 = arith.constant 0 : index
    %13 = vector.load %arg2[%c2, %c0_8, %c0_9] : memref<4x8x2xf32, #tpu.memory_space<vmem>>, vector<1x8x2xf32>
    %14 = vector.shape_cast %13 : vector<1x8x2xf32> to vector<8x2xf32>
    %15 = arith.cmpf ogt, %14, %10 : vector<8x2xf32>
    %16 = arith.select %15, %14, %10 : vector<8x2xi1>, vector<8x2xf32>
    %cst_10 = arith.constant 2.000000e+00 : f32
    %17 = vector.broadcast %cst_10 : f32 to vector<8x2xf32>
    %18 = arith.select %15, %17, %12 : vector<8x2xi1>, vector<8x2xf32>
    %c3 = arith.constant 3 : index
    %c0_11 = arith.constant 0 : index
    %c0_12 = arith.constant 0 : index
    %19 = vector.load %arg2[%c3, %c0_11, %c0_12] : memref<4x8x2xf32, #tpu.memory_space<vmem>>, vector<1x8x2xf32>
    %20 = vector.shape_cast %19 : vector<1x8x2xf32> to vector<8x2xf32>
    %21 = arith.cmpf ogt, %20, %16 : vector<8x2xf32>
    %cst_13 = arith.constant 3.000000e+00 : f32
    %22 = vector.broadcast %cst_13 : f32 to vector<8x2xf32>
    %23 = arith.select %21, %22, %18 : vector<8x2xi1>, vector<8x2xf32>
    %24 = arith.subf %23, %3 : vector<8x2xf32>
    %25 = arith.mulf %24, %24 : vector<8x2xf32>
    %c0_14 = arith.constant 0 : index
    %c0_15 = arith.constant 0 : index
    %26 = vector.load %arg5[%c0_14, %c0_15] : memref<8x2xf32, #tpu.memory_space<vmem>>, vector<8x2xf32>
    %27 = arith.addf %26, %25 : vector<8x2xf32>
    %c0_16 = arith.constant 0 : index
    %c0_17 = arith.constant 0 : index
    %28 = vector.load %arg5[%c0_16, %c0_17] : memref<8x2xf32, #tpu.memory_space<vmem>>, vector<8x2xf32>
    tpu.vector_store %arg5[%c0_16, %c0_17], %27 {strides = array<i32>} : memref<8x2xf32, #tpu.memory_space<vmem>>, vector<8x2xf32>,
    %c0_i32_18 = arith.constant 0 : i32
    %29 = arith.cmpi eq, %arg1, %c0_i32_18 : i32
    %30 = arith.extui %29 : i1 to i32
    %c0_i32_19 = arith.constant 0 : i32
    %31 = arith.cmpi ne, %30, %c0_i32_19 : i32
    scf.if %31 {
      %c0_20 = arith.constant 0 : index
      %c0_21 = arith.constant 0 : index
      %32 = vector.load %arg5[%c0_20, %c0_21] : memref<8x2xf32, #tpu.memory_space<vmem>>, vector<8x2xf32>
      %33 = vector.shape_cast %32 : vector<8x2xf32> to vector<1x8x2xf32>
      %cst_22 = arith.constant dense<0.000000e+00> : vector<1xf32>
      %34 = vector.multi_reduction <add>, %33, %cst_22 [1, 2] : vector<1x8x2xf32> to vector<1xf32>
      %35 = vector.shape_cast %34 : vector<1xf32> to vector<1x1x1xf32>
      %36 = vector.extract %35[0, 0, 0] : f32 from vector<1x1x1xf32>
      %c0_23 = arith.constant 0 : index
      %c0_24 = arith.constant 0 : index
      %37 = memref.load %arg4[%c0_23, %c0_24] : memref<1x1xf32, #tpu.memory_space<smem>>
      memref.store %36, %arg4[%c0_23, %c0_24] : memref<1x1xf32, #tpu.memory_space<smem>>
    } else {
    }
    return
  }
  func.func @transform_0(%arg0: i32, %arg1: i32) -> (i32, i32, i32) {
    %c1_i32 = arith.constant 1 : i32
    %0 = arith.muli %arg0, %c1_i32 : i32
    %1 = arith.addi %0, %arg1 : i32
    %c0_i32 = arith.constant 0 : i32
    %c0_i32_0 = arith.constant 0 : i32
    %c0_i32_1 = arith.constant 0 : i32
    return %c0_i32, %c0_i32_0, %1 : i32, i32, i32
  }
  func.func @transform_1(%arg0: i32, %arg1: i32) -> (i32, i32) {
    %c1_i32 = arith.constant 1 : i32
    %0 = arith.muli %arg0, %c1_i32 : i32
    %1 = arith.addi %0, %arg1 : i32
    %c0_i32 = arith.constant 0 : i32
    %c0_i32_0 = arith.constant 0 : i32
    return %c0_i32, %1 : i32, i32
  }
  func.func @transform_2(%arg0: i32, %arg1: i32) -> (i32, i32) {
    %c0_i32 = arith.constant 0 : i32
    %c0_i32_0 = arith.constant 0 : i32
    return %arg0, %c0_i32 : i32, i32
  }
}

</mosaic_0001>

<bundles_post_ra>
// kernel: tpu_custom_call.1
= control target key start
LH: loop header
LB: loop body
LE: loop exit
PB: predicated region body
PF: predicated region fallthrough
CT: control target
= control target key end

     0   :  { %vm50_vm0 = vcmask 15360   ;;  %v134_v2 = vmov 0.0   ;;  %s181_s0 = inlined_call_operand.vmem [shape: f32[4,8,2], index: 0, kind: input, shape index: {}]   ;;  %s182_s1 = inlined_call_operand.vmem [shape: f32[8,2], index: 1, kind: input, shape index: {}]   ;;  %s183_s2 = inlined_call_operand.hbm [shape: f32[1,1], index: 2, kind: output, shape index: {}]  }
   0x1   :  { %v53_v0 = vld [vmem:[%s181_s0] sm:$0xff]  ;;  %v115_v1 = vld [vmem:[%s181_s0 + $0x8] sm:$0xff]  ;;  %51 = vst.msk [vmem:[#allocation2] sm:$0xff] %vm50_vm0, %v134_v2  ;;  %v116_v3 = vld [vmem:[%s181_s0 + $0x10] sm:$0xff] }
   0x2   :  { %vm56_vm1 = vcmp.gt.f32.partialorder %v115_v1, %v53_v0 }
   0x3   :  { %7 = vsyncpa [#allocation4], 0  ;;  %v57_v4 = vsel %vm56_vm1, %v115_v1, %v53_v0  ;;  %v58_v5 = vsel %vm56_vm1, 1.0, %v134_v2  ;;  %v117_v6 = vld [vmem:[%s181_s0 + $0x18] sm:$0xff]  ;;  %v52_v7 = vld [vmem:[%s182_s1] sm:$0xff]  ;;  %s122_s20 = scalar_lea.hbm %s183_s2, 16 }
   0x4   :  { %vm61_vm2 = vcmp.gt.f32.partialorder %v116_v3, %v57_v4  ;;  %p123_p0 = scmp.ne.s32.totalorder %s183_s2, %s122_s20  ;;  %p126_p1 = scmp.lt.u32.totalorder %s122_s20, %s183_s2 }
   0x5   :  { %v62_v8 = vsel %vm61_vm2, %v116_v3, %v57_v4  ;;  %v63_v9 = vsel %vm61_vm2, 2.0, %v58_v5 }
   0x6   :  { %vm66_vm3 = vcmp.gt.f32.partialorder %v117_v6, %v62_v8  ;;  %p128_p2 = pnand %p126_p1, %p123_p0 }
   0x7   :  { %v67_v10 = vsel %vm66_vm3, 3.0, %v63_v9 }
   0x8   :  { %v68_v11 = vsub.f32 %v67_v10, %v52_v7  ;;  %v70_v12 = vld [vmem:[#allocation2] sm:$0xff] }
   0xa   :  { %v69_v13 = vmul.f32 %v68_v11, %v68_v11 }
   0xc   :  { %v71_v14 = vadd.f32 %v70_v12, %v69_v13 }
   0xe   :  { %73 = vst.msk [vmem:[#allocation2] sm:$0xff] %vm50_vm0, %v71_v14 }
  0x15   :  { %v77_v15 = vld [vmem:[#allocation2] sm:$0xff] }
  0x16   :  { %v78_v16 = vsel %vm50_vm0, %v77_v15, 0.0 }
  0x17   :  { %79 = vadd.xlane.f32.xlu0 %v78_v16 }
  0xa4   :  { %v80_v17 = vpop.xlane.xlu0 %79 }
  0xa5   :  { %v81_v18 = vrot.slane %v80_v17, 4 }
  0xa7   :  { %v82_v19 = vadd.f32 %v81_v18, %v80_v17 }
  0xa9   :  { %v83_v20 = vrot.slane %v82_v19, 2 }
  0xab   :  { %v84_v21 = vadd.f32 %v83_v20, %v82_v19 }
  0xad   :  { %v85_v22 = vrot.slane %v84_v21, 1 }
  0xaf   :  { %v86_v23 = vadd.f32 %v85_v22, %v84_v21 }
  0xb1   :  { %118 = vpush %v86_v23 }
  0xe2   :  { %s119_s0 = spop %118 }
  0xe3   :  { %89 = sst [smem:[#allocation3]] %s119_s0 }
  0xe4   :  { %131 = shalt.err (!%p128_p2)
}
  0xe5   :  { %s135_s25 = smov [#allocation3]  }
  0xe6   :  { %97 = dma.smem_to_hbm %s135_s25, 16, %s183_s2, [#allocation4]  }
  0xe7   :  { %132 = dma.done.wait [#allocation4], 16  }
  0xe8   :  { %133 = vsyncadd [#allocation4], 4294967280 }
  0xe9   :  { %101 = sfence }
  0xea   :  { %102 = vsyncpa [#allocation4], 1 }

</bundles_post_ra>
